<compile_context>
chip_gen: v7x
topology: tpu7x:2x2x1
jax: 0.10.0
libtpu: 0.0.40
codegen_flags: <defaults>
</compile_context>

<pallas_src>
import functools

import jax
import jax.numpy as jnp
from jax.experimental import pallas as pl
from jax.experimental.pallas import tpu as pltpu


# 32 MiB scoped VMEM: above v5e's 16 MiB default, equal to the v6e/v7x default,
# comfortably below every generation's physical VMEM.
_VMEM_LIMIT_BYTES = 32 * 1024 * 1024


# ----------------------------------------------------------------------------
# helpers
# ----------------------------------------------------------------------------
def _round_up(x, m):
    return ((x + m - 1) // m) * m


def _pick_row_tile(rows_n, max_tile):
    """Row tile for Kernel A.

    Large inputs get the biggest 256-aligned tile <= max_tile that still keeps
    >= 2 grid steps (software pipelining + v7x megacore sharding).  Small
    inputs run as a single full-extent block (always layout-legal, no padded
    compute, no extra grid-step overhead).
    """
    if rows_n < 512:
        return rows_n
    t = _round_up(pl.cdiv(rows_n, 2), 256)
    return min(t, max_tile)


def _make_pool_matrix(h14, w14):
    """(HW7, HW14) matrix implementing AvgPool2d(kernel=2, stride=2)."""
    h7, w7 = h14 // 2, w14 // 2
    p = jnp.arange(h7 * w7)
    q = jnp.arange(h14 * w14)
    ph, pw = p // w7, p % w7
    qh, qw = q // w14, q % w14
    hit = ((qh[None, :] // 2) == ph[:, None]) & ((qw[None, :] // 2) == pw[:, None])
    return hit.astype(jnp.float32) * 0.25


def _fold_bn(w, gamma, beta, mean, var, eps=1e-3):
    """Fold eval-mode BatchNorm2d into a bias-free 1x1 conv (matmul weight)."""
    scale = gamma * jax.lax.rsqrt(var + eps)
    return w * scale[None, :], beta - mean * scale


# ----------------------------------------------------------------------------
# Kernel A: fused   x = rows @ W_adap + b ;  att = relu(x @ W_att + b_bn)
# ----------------------------------------------------------------------------
def _adap_att_kernel(rows_ref, w_adap_ref, b_adap_ref, w_att_ref, b_att_ref,
                     *out_refs, emit_x):
    x = jnp.dot(rows_ref[...], w_adap_ref[...],
                preferred_element_type=jnp.float32)
    x = x + b_adap_ref[...]
    if emit_x:
        out_refs[0][...] = x.astype(out_refs[0].dtype)
    att_ref = out_refs[-1]
    w_att = w_att_ref[...]
    att = jnp.dot(x.astype(w_att.dtype), w_att,
                  preferred_element_type=jnp.float32)
    att = jnp.maximum(att + b_att_ref[...], 0.0)
    att_ref[...] = att.astype(att_ref.dtype)


def fused_adap_att(rows, w_adap, b_adap, w_att, b_att, *, emit_x,
                   max_tile_rows):
    rows_n, cin = rows.shape
    cout = w_adap.shape[1]
    m = w_att.shape[1]

    tm = _pick_row_tile(rows_n, max_tile_rows)
    grid = (pl.cdiv(rows_n, tm),)   # ragged last block is masked by Pallas

    # Loop-invariant operands are single-buffered: double-buffering them wastes
    # VMEM with zero pipelining benefit (their index_map is constant).
    in_specs = [
        pl.BlockSpec((tm, cin), lambda i: (i, 0)),
        pl.BlockSpec((cin, cout), lambda i: (0, 0), pipeline_mode=pl.Buffered(1)),
        pl.BlockSpec((1, cout), lambda i: (0, 0), pipeline_mode=pl.Buffered(1)),
        pl.BlockSpec((cout, m), lambda i: (0, 0), pipeline_mode=pl.Buffered(1)),
        pl.BlockSpec((1, m), lambda i: (0, 0), pipeline_mode=pl.Buffered(1)),
    ]

    if emit_x:
        out_shape = (jax.ShapeDtypeStruct((rows_n, cout), jnp.float32),
                     jax.ShapeDtypeStruct((rows_n, m), jnp.float32))
        out_specs = (pl.BlockSpec((tm, cout), lambda i: (i, 0)),
                     pl.BlockSpec((tm, m), lambda i: (i, 0)))
    else:
        out_shape = jax.ShapeDtypeStruct((rows_n, m), jnp.float32)
        out_specs = pl.BlockSpec((tm, m), lambda i: (i, 0))

    kern = functools.partial(_adap_att_kernel, emit_x=emit_x)
    return pl.pallas_call(
        kern,
        out_shape=out_shape,
        grid_spec=pltpu.PrefetchScalarGridSpec(
            num_scalar_prefetch=0,
            grid=grid,
            in_specs=in_specs,
            out_specs=out_specs,
        ),
        compiler_params=pltpu.CompilerParams(
            dimension_semantics=("parallel",),
            vmem_limit_bytes=_VMEM_LIMIT_BYTES),
    )(rows.astype(jnp.bfloat16),
      w_adap.astype(jnp.bfloat16),
      b_adap.reshape(1, cout).astype(jnp.float32),
      w_att.astype(jnp.bfloat16),
      b_att.reshape(1, m).astype(jnp.float32))


# ----------------------------------------------------------------------------
# Kernel B: batched fused  pool+add  ->  WSLL (Conv1d folded)  ->  cls head
# ----------------------------------------------------------------------------
def _head_kernel(sem_ref, tex_ref, feat_ref, pool_ref, w1_ref, wcls_ref,
                 bcls_ref, b1_ref, att_ref, cls_ref, *, inv_hw):
    sem = sem_ref[...]            # (Bb, HW7,  M)  f32
    tex = tex_ref[...]            # (Bb, HW14, M)  f32
    feat = feat_ref[...]          # (Bb, HW7,  C)  f32
    pool = pool_ref[...]          # (HW7, HW14)    f32
    bb = sem.shape[0]

    # attention_output = semantic + AvgPool2x2(texture); pooling is a batched
    # matmul against the small resident pooling matrix (MXU, not VPU/XLU).
    poolb = jnp.broadcast_to(pool[None], (bb,) + pool.shape)
    pooled = jnp.einsum('bqk,bkm->bqm', poolb, tex,
                        preferred_element_type=jnp.float32)          # (Bb,HW7,M)
    att = sem + pooled
    att_ref[...] = att.astype(att_ref.dtype)

    # WSLL with the Conv1d(M->1) collapse folded in; both contractions on MXU:
    #   fm[b,c] = (1/HW) * sum_hw (sum_m att[b,hw,m]*w1d[m]) * feat[b,hw,c] + b1d
    wvec = jnp.einsum('bqm,mo->bqo', att, w1_ref[...],
                      preferred_element_type=jnp.float32)             # (Bb,HW7,1)
    fm = jnp.einsum('bqo,bqc->boc', wvec, feat,
                    preferred_element_type=jnp.float32)               # (Bb,1,C)
    fm = fm[:, 0, :] * inv_hw + b1_ref[0]                             # (Bb,C)

    # cls head: LeakyReLU(0.01) + Linear
    lr = jnp.where(fm >= 0.0, fm, 0.01 * fm)
    cls = jnp.dot(lr, wcls_ref[...], preferred_element_type=jnp.float32)
    cls_ref[...] = (cls + bcls_ref[...]).astype(cls_ref.dtype)


def fused_head(sem_cl, tex_cl, feat_cl, pool_mat, w1d, b1d, w_cls, b_cls):
    B, HW7, M = sem_cl.shape
    HW14 = tex_cl.shape[1]
    C = feat_cl.shape[2]
    ncls = w_cls.shape[1]

    # Multiple batch elements per grid step (whole batch if small) so the
    # per-step overhead is amortized; Bb is either B (full dim) or 8 (8-aligned).
    Bb = B if B <= 8 else 8
    grid = (pl.cdiv(B, Bb),)

    kern = functools.partial(_head_kernel, inv_hw=1.0 / float(HW7))
    att, cls = pl.pallas_call(
        kern,
        out_shape=(jax.ShapeDtypeStruct((B, HW7, M), jnp.float32),
                   jax.ShapeDtypeStruct((B, ncls), jnp.float32)),
        grid_spec=pltpu.PrefetchScalarGridSpec(
            num_scalar_prefetch=0,
            grid=grid,
            in_specs=[
                pl.BlockSpec((Bb, HW7, M), lambda b: (b, 0, 0)),
                pl.BlockSpec((Bb, HW14, M), lambda b: (b, 0, 0)),
                pl.BlockSpec((Bb, HW7, C), lambda b: (b, 0, 0)),
                pl.BlockSpec((HW7, HW14), lambda b: (0, 0),
                             pipeline_mode=pl.Buffered(1)),
                pl.BlockSpec((M, 1), lambda b: (0, 0),
                             pipeline_mode=pl.Buffered(1)),
                pl.BlockSpec((C, ncls), lambda b: (0, 0),
                             pipeline_mode=pl.Buffered(1)),
                pl.BlockSpec((1, ncls), lambda b: (0, 0),
                             pipeline_mode=pl.Buffered(1)),
                # scalar Conv1d bias lives in SMEM: no VMEM (8,128) padding, no DMA
                pl.BlockSpec(memory_space=pltpu.MemorySpace.SMEM),
            ],
            out_specs=(pl.BlockSpec((Bb, HW7, M), lambda b: (b, 0, 0)),
                       pl.BlockSpec((Bb, ncls), lambda b: (b, 0))),
        ),
        compiler_params=pltpu.CompilerParams(
            dimension_semantics=("parallel",),
            vmem_limit_bytes=_VMEM_LIMIT_BYTES),
    )(sem_cl.astype(jnp.float32),
      tex_cl.astype(jnp.float32),
      feat_cl.astype(jnp.float32),
      pool_mat.astype(jnp.float32),
      w1d.reshape(M, 1).astype(jnp.float32),
      w_cls.astype(jnp.float32),
      b_cls.reshape(1, ncls).astype(jnp.float32),
      b1d.reshape(-1).astype(jnp.float32))
    return att, cls


# ----------------------------------------------------------------------------
# effiEncoder.forward (post-backbone)
# ----------------------------------------------------------------------------
def effi_encoder_forward(feat14, feat7, p):
    B, C14, H14, W14 = feat14.shape
    _, C7, H7, W7 = feat7.shape
    M = p["w_att_tex"].shape[1]
    D7 = p["w_adap7"].shape[1]
    HW14, HW7 = H14 * W14, H7 * W7

    # eval-mode BatchNorm folded into the bias-free attention 1x1 convs.
    w_tex, b_tex = _fold_bn(p["w_att_tex"], p["bn_tex_gamma"], p["bn_tex_beta"],
                            p["bn_tex_mean"], p["bn_tex_var"])
    w_sem, b_sem = _fold_bn(p["w_att_sem"], p["bn_sem_gamma"], p["bn_sem_beta"],
                            p["bn_sem_mean"], p["bn_sem_var"])

    # NCHW -> channels-last rows (glue; fuses with the bf16 cast inside the call).
    rows14 = feat14.transpose(0, 2, 3, 1).reshape(B * HW14, C14)
    rows7 = feat7.transpose(0, 2, 3, 1).reshape(B * HW7, C7)

    # Kernel A: fused adaptation conv + attention conv (+BN+ReLU).
    # feat14 path (Cout=1024, x stays in VMEM): tiles up to 1024 rows.
    # feat7 path (Cout=2048, x written to HBM): tiles capped at 512 rows (VMEM).
    tex_rows = fused_adap_att(rows14, p["w_adap14"], p["b_adap14"],
                              w_tex, b_tex, emit_x=False, max_tile_rows=1024)
    x7_rows, sem_rows = fused_adap_att(rows7, p["w_adap7"], p["b_adap7"],
                                       w_sem, b_sem, emit_x=True,
                                       max_tile_rows=512)

    # Kernel B: pool+add, WSLL with Conv1d collapse folded, LeakyReLU+Linear head.
    pool_mat = _make_pool_matrix(H14, W14)
    att_cl, cls_pred = fused_head(
        sem_rows.reshape(B, HW7, M),
        tex_rows.reshape(B, HW14, M),
        x7_rows.reshape(B, HW7, D7),
        pool_mat,
        p["w_conv1d"], p["b_conv1d"], p["w_cls"], p["b_cls"])

    att_maps = att_cl.reshape(B, H7, W7, M).transpose(0, 3, 1, 2)   # (B, M, H7, W7)
    return cls_pred, att_maps


# ----------------------------------------------------------------------------
# Pure-JAX f32 reference for correctness
# ----------------------------------------------------------------------------
def reference(feat14, feat7, p):
    hp = jax.lax.Precision.HIGHEST
    B, C14, H14, W14 = feat14.shape
    _, C7, H7, W7 = feat7.shape
    M = p["w_att_tex"].shape[1]
    D7 = p["w_adap7"].shape[1]
    r14 = feat14.transpose(0, 2, 3, 1).reshape(-1, C14)
    r7 = feat7.transpose(0, 2, 3, 1).reshape(-1, C7)
    x14 = jnp.dot(r14, p["w_adap14"], precision=hp) + p["b_adap14"]
    x7 = jnp.dot(r7, p["w_adap7"], precision=hp) + p["b_adap7"]

    def bn(y, g, b, m, v, eps=1e-3):
        return (y - m) * (g / jnp.sqrt(v + eps)) + b

    tex = jax.nn.relu(bn(jnp.dot(x14, p["w_att_tex"], precision=hp),
                         p["bn_tex_gamma"], p["bn_tex_beta"],
                         p["bn_tex_mean"], p["bn_tex_var"]))
    sem = jax.nn.relu(bn(jnp.dot(x7, p["w_att_sem"], precision=hp),
                         p["bn_sem_gamma"], p["bn_sem_beta"],
                         p["bn_sem_mean"], p["bn_sem_var"]))
    tex = tex.reshape(B, H14, W14, M).transpose(0, 3, 1, 2)
    sem = sem.reshape(B, H7, W7, M).transpose(0, 3, 1, 2)
    att = sem + tex.reshape(B, M, H7, 2, W7, 2).mean(axis=(3, 5))
    feat7a = x7.reshape(B, H7, W7, D7).transpose(0, 3, 1, 2)
    fm = jnp.einsum('imjk,injk->imn', att, feat7a, precision=hp) / float(H7 * W7)
    fm = jnp.einsum('m,bmc->bc', p["w_conv1d"][0], fm, precision=hp) + p["b_conv1d"][0, 0]
    cls = jnp.dot(jax.nn.leaky_relu(fm), p["w_cls"], precision=hp) + p["b_cls"]
    return cls, att


if __name__ == "__main__":
    # small shapes consistent with the module (scaled-down channel dims)
    B = 2
    C14_in, C7_in = 16, 32        # stand-ins for feat_channel_list[-2:] = [136, 384]
    D14, D7 = 64, 128             # stand-ins for adap_conv outputs 1024 / 2048
    M = 32                        # config.attention_map_num
    NCLS = 5                      # config.class_num
    H14 = W14 = 8                 # stand-in for feat_size_list[-2] = 14
    H7 = W7 = 4                   # stand-in for feat_size_list[-1] = 7

    key = jax.random.PRNGKey(0)
    ks = jax.random.split(key, 20)

    def tn(k, shape, std=0.02):   # trunc_normal_(std=0.02)
        return (std * jax.random.truncated_normal(k, -2.0, 2.0, shape)).astype(jnp.float32)

    params = {
        "w_adap14": tn(ks[0], (C14_in, D14)),
        "b_adap14": tn(ks[1], (D14,)),
        "w_adap7": tn(ks[2], (C7_in, D7)),
        "b_adap7": tn(ks[3], (D7,)),
        # attention convs (bias=False) followed by eval-mode BatchNorm2d(eps=1e-3)
        "w_att_tex": tn(ks[4], (D14, M)),
        "w_att_sem": tn(ks[5], (D7, M)),
        "bn_tex_gamma": 1.0 + 0.2 * jax.random.normal(ks[6], (M,), jnp.float32),
        "bn_tex_beta": 0.1 * jax.random.normal(ks[7], (M,), jnp.float32),
        "bn_tex_mean": 0.05 * jax.random.normal(ks[8], (M,), jnp.float32),
        "bn_tex_var": 0.5 + jax.random.uniform(ks[9], (M,), jnp.float32),
        "bn_sem_gamma": 1.0 + 0.2 * jax.random.normal(ks[10], (M,), jnp.float32),
        "bn_sem_beta": 0.1 * jax.random.normal(ks[11], (M,), jnp.float32),
        "bn_sem_mean": 0.05 * jax.random.normal(ks[12], (M,), jnp.float32),
        "bn_sem_var": 0.5 + jax.random.uniform(ks[13], (M,), jnp.float32),
        # Conv1d(in=M, out=1, k=1): weight (1, M), bias (1, 1)
        "w_conv1d": tn(ks[14], (1, M)),
        "b_conv1d": tn(ks[15], (1, 1)),
        # cls head Linear(D7 -> NCLS)
        "w_cls": tn(ks[16], (D7, NCLS)),
        "b_cls": tn(ks[17], (NCLS,)),
    }

    # deterministic stand-ins for the EfficientNet backbone outputs (NCHW)
    feat14 = jax.random.normal(ks[18], (B, C14_in, H14, W14), jnp.float32)
    feat7 = jax.random.normal(ks[19], (B, C7_in, H7, W7), jnp.float32)

    fwd = jax.jit(effi_encoder_forward)
    cls_pred, att_maps = fwd(feat14, feat7, params)
    jax.block_until_ready((cls_pred, att_maps))

    cls_ref, att_ref = reference(feat14, feat7, params)
    assert cls_pred.shape == (B, NCLS) and att_maps.shape == (B, M, H7, W7)
    assert jnp.allclose(cls_pred, cls_ref, rtol=2e-2, atol=2e-2), \
        float(jnp.max(jnp.abs(cls_pred - cls_ref)))
    assert jnp.allclose(att_maps, att_ref, rtol=2e-2, atol=2e-2), \
        float(jnp.max(jnp.abs(att_maps - att_ref)))

    print("KERNEL_OK")
</pallas_src>

<mosaic_0001>
module attributes {stable_mosaic.version = 11 : i64} {
  func.func @_adap_att_kernel(%arg0: i32, %arg1: memref<128x16xbf16, #tpu.memory_space<vmem>>, %arg2: memref<16x64xbf16, #tpu.memory_space<vmem>>, %arg3: memref<1x64xf32, #tpu.memory_space<vmem>>, %arg4: memref<64x32xbf16, #tpu.memory_space<vmem>>, %arg5: memref<1x32xf32, #tpu.memory_space<vmem>>, %arg6: memref<128x32xf32, #tpu.memory_space<vmem>>) attributes {dimension_semantics = [#tpu.dimension_semantics<parallel>], iteration_bounds = array<i64: 1>, scalar_prefetch = 0 : i64, scratch_operands = 0 : i64, tpu.core_type = #tpu.core_type<tc>, window_params = [{transform_indices = @transform_0, window_bounds = array<i64: 128, 16>}, {pipeline_mode = #tpu.pipeline_mode<synchronous>, transform_indices = @transform_1, window_bounds = array<i64: 16, 64>}, {pipeline_mode = #tpu.pipeline_mode<synchronous>, transform_indices = @transform_2, window_bounds = array<i64: 1, 64>}, {pipeline_mode = #tpu.pipeline_mode<synchronous>, transform_indices = @transform_3, window_bounds = array<i64: 64, 32>}, {pipeline_mode = #tpu.pipeline_mode<synchronous>, transform_indices = @transform_4, window_bounds = array<i64: 1, 32>}, {transform_indices = @transform_5, window_bounds = array<i64: 128, 32>}]} {
    %c0 = arith.constant 0 : index
    %c0_0 = arith.constant 0 : index
    %0 = vector.load %arg1[%c0, %c0_0] : memref<128x16xbf16, #tpu.memory_space<vmem>>, vector<128x16xbf16>
    %c0_1 = arith.constant 0 : index
    %c0_2 = arith.constant 0 : index
    %1 = vector.load %arg2[%c0_1, %c0_2] : memref<16x64xbf16, #tpu.memory_space<vmem>>, vector<16x64xbf16>
    %cst = arith.constant dense<0.000000e+00> : vector<128x64xf32>
    %2 = tpu.matmul %0, %1, %cst {dimension_numbers = #tpu.dot_dimension_numbers<[1], [0], [0], [1], [0, 0, 1, 1], [], []>} : vector<128x16xbf16>, vector<16x64xbf16>, vector<128x64xf32> -> vector<128x64xf32>
    %c0_3 = arith.constant 0 : index
    %c0_4 = arith.constant 0 : index
    %3 = vector.load %arg3[%c0_3, %c0_4] : memref<1x64xf32, #tpu.memory_space<vmem>>, vector<1x64xf32>
    %4 = vector.broadcast %3 : vector<1x64xf32> to vector<128x64xf32>
    %5 = arith.addf %2, %4 : vector<128x64xf32>
    %c0_5 = arith.constant 0 : index
    %c0_6 = arith.constant 0 : index
    %6 = vector.load %arg4[%c0_5, %c0_6] : memref<64x32xbf16, #tpu.memory_space<vmem>>, vector<64x32xbf16>
    %7 = arith.truncf %5 : vector<128x64xf32> to vector<128x64xbf16>
    %cst_7 = arith.constant dense<0.000000e+00> : vector<128x32xf32>
    %8 = tpu.matmul %7, %6, %cst_7 {dimension_numbers = #tpu.dot_dimension_numbers<[1], [0], [0], [1], [0, 0, 1, 1], [], []>} : vector<128x64xbf16>, vector<64x32xbf16>, vector<128x32xf32> -> vector<128x32xf32>
    %c0_8 = arith.constant 0 : index
    %c0_9 = arith.constant 0 : index
    %9 = vector.load %arg5[%c0_8, %c0_9] : memref<1x32xf32, #tpu.memory_space<vmem>>, vector<1x32xf32>
    %10 = vector.broadcast %9 : vector<1x32xf32> to vector<128x32xf32>
    %11 = arith.addf %8, %10 : vector<128x32xf32>
    %cst_10 = arith.constant 0.000000e+00 : f32
    %12 = vector.broadcast %cst_10 : f32 to vector<128x32xf32>
    %13 = arith.maximumf %11, %12 : vector<128x32xf32>
    %c0_11 = arith.constant 0 : index
    %c0_12 = arith.constant 0 : index
    %14 = vector.load %arg6[%c0_11, %c0_12] : memref<128x32xf32, #tpu.memory_space<vmem>>, vector<128x32xf32>
    tpu.vector_store %arg6[%c0_11, %c0_12], %13 {strides = array<i32>} : memref<128x32xf32, #tpu.memory_space<vmem>>, vector<128x32xf32>,
    return
  }
  func.func @transform_0(%arg0: i32) -> (i32, i32) {
    %c0_i32 = arith.constant 0 : i32
    %c0_i32_0 = arith.constant 0 : i32
    return %arg0, %c0_i32 : i32, i32
  }
  func.func @transform_1(%arg0: i32) -> (i32, i32) {
    %c0_i32 = arith.constant 0 : i32
    %c0_i32_0 = arith.constant 0 : i32
    %c0_i32_1 = arith.constant 0 : i32
    return %c0_i32, %c0_i32_0 : i32, i32
  }
  func.func @transform_2(%arg0: i32) -> (i32, i32) {
    %c0_i32 = arith.constant 0 : i32
    %c0_i32_0 = arith.constant 0 : i32
    %c0_i32_1 = arith.constant 0 : i32
    return %c0_i32, %c0_i32_0 : i32, i32
  }
  func.func @transform_3(%arg0: i32) -> (i32, i32) {
    %c0_i32 = arith.constant 0 : i32
    %c0_i32_0 = arith.constant 0 : i32
    %c0_i32_1 = arith.constant 0 : i32
    return %c0_i32, %c0_i32_0 : i32, i32
  }
  func.func @transform_4(%arg0: i32) -> (i32, i32) {
    %c0_i32 = arith.constant 0 : i32
    %c0_i32_0 = arith.constant 0 : i32
    %c0_i32_1 = arith.constant 0 : i32
    return %c0_i32, %c0_i32_0 : i32, i32
  }
  func.func @transform_5(%arg0: i32) -> (i32, i32) {
    %c0_i32 = arith.constant 0 : i32
    %c0_i32_0 = arith.constant 0 : i32
    return %arg0, %c0_i32 : i32, i32
  }
}

module attributes {stable_mosaic.version = 11 : i64} {
  func.func @_adap_att_kernel(%arg0: i32, %arg1: memref<32x32xbf16, #tpu.memory_space<vmem>>, %arg2: memref<32x128xbf16, #tpu.memory_space<vmem>>, %arg3: memref<1x128xf32, #tpu.memory_space<vmem>>, %arg4: memref<128x32xbf16, #tpu.memory_space<vmem>>, %arg5: memref<1x32xf32, #tpu.memory_space<vmem>>, %arg6: memref<32x128xf32, #tpu.memory_space<vmem>>, %arg7: memref<32x32xf32, #tpu.memory_space<vmem>>) attributes {dimension_semantics = [#tpu.dimension_semantics<parallel>], iteration_bounds = array<i64: 1>, scalar_prefetch = 0 : i64, scratch_operands = 0 : i64, tpu.core_type = #tpu.core_type<tc>, window_params = [{transform_indices = @transform_0, window_bounds = array<i64: 32, 32>}, {pipeline_mode = #tpu.pipeline_mode<synchronous>, transform_indices = @transform_1, window_bounds = array<i64: 32, 128>}, {pipeline_mode = #tpu.pipeline_mode<synchronous>, transform_indices = @transform_2, window_bounds = array<i64: 1, 128>}, {pipeline_mode = #tpu.pipeline_mode<synchronous>, transform_indices = @transform_3, window_bounds = array<i64: 128, 32>}, {pipeline_mode = #tpu.pipeline_mode<synchronous>, transform_indices = @transform_4, window_bounds = array<i64: 1, 32>}, {transform_indices = @transform_5, window_bounds = array<i64: 32, 128>}, {transform_indices = @transform_6, window_bounds = array<i64: 32, 32>}]} {
    %c0 = arith.constant 0 : index
    %c0_0 = arith.constant 0 : index
    %0 = vector.load %arg1[%c0, %c0_0] : memref<32x32xbf16, #tpu.memory_space<vmem>>, vector<32x32xbf16>
    %c0_1 = arith.constant 0 : index
    %c0_2 = arith.constant 0 : index
    %1 = vector.load %arg2[%c0_1, %c0_2] : memref<32x128xbf16, #tpu.memory_space<vmem>>, vector<32x128xbf16>
    %cst = arith.constant dense<0.000000e+00> : vector<32x128xf32>
    %2 = tpu.matmul %0, %1, %cst {dimension_numbers = #tpu.dot_dimension_numbers<[1], [0], [0], [1], [0, 0, 1, 1], [], []>} : vector<32x32xbf16>, vector<32x128xbf16>, vector<32x128xf32> -> vector<32x128xf32>
    %c0_3 = arith.constant 0 : index
    %c0_4 = arith.constant 0 : index
    %3 = vector.load %arg3[%c0_3, %c0_4] : memref<1x128xf32, #tpu.memory_space<vmem>>, vector<1x128xf32>
    %4 = vector.broadcast %3 : vector<1x128xf32> to vector<32x128xf32>
    %5 = arith.addf %2, %4 : vector<32x128xf32>
    %c0_5 = arith.constant 0 : index
    %c0_6 = arith.constant 0 : index
    %6 = vector.load %arg6[%c0_5, %c0_6] : memref<32x128xf32, #tpu.memory_space<vmem>>, vector<32x128xf32>
    tpu.vector_store %arg6[%c0_5, %c0_6], %5 {strides = array<i32>} : memref<32x128xf32, #tpu.memory_space<vmem>>, vector<32x128xf32>,
    %c0_7 = arith.constant 0 : index
    %c0_8 = arith.constant 0 : index
    %7 = vector.load %arg4[%c0_7, %c0_8] : memref<128x32xbf16, #tpu.memory_space<vmem>>, vector<128x32xbf16>
    %8 = arith.truncf %5 : vector<32x128xf32> to vector<32x128xbf16>
    %cst_9 = arith.constant dense<0.000000e+00> : vector<32x32xf32>
    %9 = tpu.matmul %8, %7, %cst_9 {dimension_numbers = #tpu.dot_dimension_numbers<[1], [0], [0], [1], [0, 0, 1, 1], [], []>} : vector<32x128xbf16>, vector<128x32xbf16>, vector<32x32xf32> -> vector<32x32xf32>
    %c0_10 = arith.constant 0 : index
    %c0_11 = arith.constant 0 : index
    %10 = vector.load %arg5[%c0_10, %c0_11] : memref<1x32xf32, #tpu.memory_space<vmem>>, vector<1x32xf32>
    %11 = vector.broadcast %10 : vector<1x32xf32> to vector<32x32xf32>
    %12 = arith.addf %9, %11 : vector<32x32xf32>
    %cst_12 = arith.constant 0.000000e+00 : f32
    %13 = vector.broadcast %cst_12 : f32 to vector<32x32xf32>
    %14 = arith.maximumf %12, %13 : vector<32x32xf32>
    %c0_13 = arith.constant 0 : index
    %c0_14 = arith.constant 0 : index
    %15 = vector.load %arg7[%c0_13, %c0_14] : memref<32x32xf32, #tpu.memory_space<vmem>>, vector<32x32xf32>
    tpu.vector_store %arg7[%c0_13, %c0_14], %14 {strides = array<i32>} : memref<32x32xf32, #tpu.memory_space<vmem>>, vector<32x32xf32>,
    return
  }
  func.func @transform_0(%arg0: i32) -> (i32, i32) {
    %c0_i32 = arith.constant 0 : i32
    %c0_i32_0 = arith.constant 0 : i32
    return %arg0, %c0_i32 : i32, i32
  }
  func.func @transform_1(%arg0: i32) -> (i32, i32) {
    %c0_i32 = arith.constant 0 : i32
    %c0_i32_0 = arith.constant 0 : i32
    %c0_i32_1 = arith.constant 0 : i32
    return %c0_i32, %c0_i32_0 : i32, i32
  }
  func.func @transform_2(%arg0: i32) -> (i32, i32) {
    %c0_i32 = arith.constant 0 : i32
    %c0_i32_0 = arith.constant 0 : i32
    %c0_i32_1 = arith.constant 0 : i32
    return %c0_i32, %c0_i32_0 : i32, i32
  }
  func.func @transform_3(%arg0: i32) -> (i32, i32) {
    %c0_i32 = arith.constant 0 : i32
    %c0_i32_0 = arith.constant 0 : i32
    %c0_i32_1 = arith.constant 0 : i32
    return %c0_i32, %c0_i32_0 : i32, i32
  }
  func.func @transform_4(%arg0: i32) -> (i32, i32) {
    %c0_i32 = arith.constant 0 : i32
    %c0_i32_0 = arith.constant 0 : i32
    %c0_i32_1 = arith.constant 0 : i32
    return %c0_i32, %c0_i32_0 : i32, i32
  }
  func.func @transform_5(%arg0: i32) -> (i32, i32) {
    %c0_i32 = arith.constant 0 : i32
    %c0_i32_0 = arith.constant 0 : i32
    return %arg0, %c0_i32 : i32, i32
  }
  func.func @transform_6(%arg0: i32) -> (i32, i32) {
    %c0_i32 = arith.constant 0 : i32
    %c0_i32_0 = arith.constant 0 : i32
    return %arg0, %c0_i32 : i32, i32
  }
}

module attributes {stable_mosaic.version = 11 : i64} {
  func.func @_head_kernel(%arg0: i32, %arg1: memref<2x16x32xf32, #tpu.memory_space<vmem>>, %arg2: memref<2x64x32xf32, #tpu.memory_space<vmem>>, %arg3: memref<2x16x128xf32, #tpu.memory_space<vmem>>, %arg4: memref<16x64xf32, #tpu.memory_space<vmem>>, %arg5: memref<32x1xf32, #tpu.memory_space<vmem>>, %arg6: memref<128x5xf32, #tpu.memory_space<vmem>>, %arg7: memref<1x5xf32, #tpu.memory_space<vmem>>, %arg8: memref<1xf32, #tpu.memory_space<smem>>, %arg9: memref<2x16x32xf32, #tpu.memory_space<vmem>>, %arg10: memref<2x5xf32, #tpu.memory_space<vmem>>) attributes {dimension_semantics = [#tpu.dimension_semantics<parallel>], iteration_bounds = array<i64: 1>, scalar_prefetch = 0 : i64, scratch_operands = 0 : i64, tpu.core_type = #tpu.core_type<tc>, window_params = [{transform_indices = @transform_0, window_bounds = array<i64: 2, 16, 32>}, {transform_indices = @transform_1, window_bounds = array<i64: 2, 64, 32>}, {transform_indices = @transform_2, window_bounds = array<i64: 2, 16, 128>}, {pipeline_mode = #tpu.pipeline_mode<synchronous>, transform_indices = @transform_3, window_bounds = array<i64: 16, 64>}, {pipeline_mode = #tpu.pipeline_mode<synchronous>, transform_indices = @transform_4, window_bounds = array<i64: 32, 1>}, {pipeline_mode = #tpu.pipeline_mode<synchronous>, transform_indices = @transform_5, window_bounds = array<i64: 128, 5>}, {pipeline_mode = #tpu.pipeline_mode<synchronous>, transform_indices = @transform_6, window_bounds = array<i64: 1, 5>}, {transform_indices = @transform_7, window_bounds = array<i64: 1>}, {transform_indices = @transform_8, window_bounds = array<i64: 2, 16, 32>}, {transform_indices = @transform_9, window_bounds = array<i64: 2, 5>}]} {
    %c0 = arith.constant 0 : index
    %c0_0 = arith.constant 0 : index
    %c0_1 = arith.constant 0 : index
    %0 = vector.load %arg1[%c0, %c0_0, %c0_1] : memref<2x16x32xf32, #tpu.memory_space<vmem>>, vector<2x16x32xf32>
    %c0_2 = arith.constant 0 : index
    %c0_3 = arith.constant 0 : index
    %c0_4 = arith.constant 0 : index
    %1 = vector.load %arg2[%c0_2, %c0_3, %c0_4] : memref<2x64x32xf32, #tpu.memory_space<vmem>>, vector<2x64x32xf32>
    %c0_5 = arith.constant 0 : index
    %c0_6 = arith.constant 0 : index
    %c0_7 = arith.constant 0 : index
    %2 = vector.load %arg3[%c0_5, %c0_6, %c0_7] : memref<2x16x128xf32, #tpu.memory_space<vmem>>, vector<2x16x128xf32>
    %c0_8 = arith.constant 0 : index
    %c0_9 = arith.constant 0 : index
    %3 = vector.load %arg4[%c0_8, %c0_9] : memref<16x64xf32, #tpu.memory_space<vmem>>, vector<16x64xf32>
    %4 = vector.shape_cast %3 : vector<16x64xf32> to vector<1x16x64xf32>
    %5 = vector.shape_cast %4 : vector<1x16x64xf32> to vector<1x16x64xf32>
    %6 = vector.broadcast %5 : vector<1x16x64xf32> to vector<2x16x64xf32>
    "tpu.trace_start"() <{level = 10 : i32, message = "bqk,bkm->bqm"}> : () -> ()
    %cst = arith.constant dense<0.000000e+00> : vector<2x16x32xf32>
    %7 = tpu.matmul %6, %1, %cst {dimension_numbers = #tpu.dot_dimension_numbers<[2], [1], [1], [2], [0, 0, 0, 1, 1, 2], [0], [0]>} : vector<2x16x64xf32>, vector<2x64x32xf32>, vector<2x16x32xf32> -> vector<2x16x32xf32>
    "tpu.trace_stop"() : () -> ()
    %8 = arith.addf %0, %7 : vector<2x16x32xf32>
    %c0_10 = arith.constant 0 : index
    %c0_11 = arith.constant 0 : index
    %c0_12 = arith.constant 0 : index
    %9 = vector.load %arg9[%c0_10, %c0_11, %c0_12] : memref<2x16x32xf32, #tpu.memory_space<vmem>>, vector<2x16x32xf32>
    tpu.vector_store %arg9[%c0_10, %c0_11, %c0_12], %8 {strides = array<i32>} : memref<2x16x32xf32, #tpu.memory_space<vmem>>, vector<2x16x32xf32>,
    %c0_13 = arith.constant 0 : index
    %c0_14 = arith.constant 0 : index
    %10 = vector.load %arg5[%c0_13, %c0_14] : memref<32x1xf32, #tpu.memory_space<vmem>>, vector<32x1xf32>
    "tpu.trace_start"() <{level = 10 : i32, message = "bqm,mo->bqo"}> : () -> ()
    %cst_15 = arith.constant dense<0.000000e+00> : vector<2x16x1xf32>
    %11 = tpu.matmul %8, %10, %cst_15 {dimension_numbers = #tpu.dot_dimension_numbers<[2], [0], [0, 1], [1], [0, 0, 0, 1, 1, 1], [], []>} : vector<2x16x32xf32>, vector<32x1xf32>, vector<2x16x1xf32> -> vector<2x16x1xf32>
    "tpu.trace_stop"() : () -> ()
    "tpu.trace_start"() <{level = 10 : i32, message = "bqo,bqc->boc"}> : () -> ()
    %cst_16 = arith.constant dense<0.000000e+00> : vector<2x1x128xf32>
    %12 = tpu.matmul %11, %2, %cst_16 {dimension_numbers = #tpu.dot_dimension_numbers<[1], [1], [2], [2], [0, 0, 0, 2, 1, 2], [0], [0]>} : vector<2x16x1xf32>, vector<2x16x128xf32>, vector<2x1x128xf32> -> vector<2x1x128xf32>
    "tpu.trace_stop"() : () -> ()
    %13 = vector.shape_cast %12 : vector<2x1x128xf32> to vector<2x128xf32>
    %cst_17 = arith.constant 6.250000e-02 : f32
    %14 = vector.broadcast %cst_17 : f32 to vector<2x128xf32>
    %15 = arith.mulf %13, %14 : vector<2x128xf32>
    %c0_18 = arith.constant 0 : index
    %16 = memref.load %arg8[%c0_18] : memref<1xf32, #tpu.memory_space<smem>>
    %17 = vector.broadcast %16 : f32 to vector<2x128xf32>
    %18 = arith.addf %15, %17 : vector<2x128xf32>
    %cst_19 = arith.constant 0.000000e+00 : f32
    %19 = vector.broadcast %cst_19 : f32 to vector<2x128xf32>
    %20 = arith.cmpf oge, %18, %19 : vector<2x128xf32>
    %cst_20 = arith.constant 0.00999999977 : f32
    %21 = vector.broadcast %cst_20 : f32 to vector<2x128xf32>
    %22 = arith.mulf %21, %18 : vector<2x128xf32>
    %23 = arith.select %20, %18, %22 : vector<2x128xi1>, vector<2x128xf32>
    %c0_21 = arith.constant 0 : index
    %c0_22 = arith.constant 0 : index
    %24 = vector.load %arg6[%c0_21, %c0_22] : memref<128x5xf32, #tpu.memory_space<vmem>>, vector<128x5xf32>
    %cst_23 = arith.constant dense<0.000000e+00> : vector<2x5xf32>
    %25 = tpu.matmul %23, %24, %cst_23 {dimension_numbers = #tpu.dot_dimension_numbers<[1], [0], [0], [1], [0, 0, 1, 1], [], []>} : vector<2x128xf32>, vector<128x5xf32>, vector<2x5xf32> -> vector<2x5xf32>
    %c0_24 = arith.constant 0 : index
    %c0_25 = arith.constant 0 : index
    %26 = vector.load %arg7[%c0_24, %c0_25] : memref<1x5xf32, #tpu.memory_space<vmem>>, vector<1x5xf32>
    %27 = vector.broadcast %26 : vector<1x5xf32> to vector<2x5xf32>
    %28 = arith.addf %25, %27 : vector<2x5xf32>
    %c0_26 = arith.constant 0 : index
    %c0_27 = arith.constant 0 : index
    %29 = vector.load %arg10[%c0_26, %c0_27] : memref<2x5xf32, #tpu.memory_space<vmem>>, vector<2x5xf32>
    tpu.vector_store %arg10[%c0_26, %c0_27], %28 {strides = array<i32>} : memref<2x5xf32, #tpu.memory_space<vmem>>, vector<2x5xf32>,
    return
  }
  func.func @transform_0(%arg0: i32) -> (i32, i32, i32) {
    %c0_i32 = arith.constant 0 : i32
    %c0_i32_0 = arith.constant 0 : i32
    %c0_i32_1 = arith.constant 0 : i32
    return %arg0, %c0_i32, %c0_i32_0 : i32, i32, i32
  }
  func.func @transform_1(%arg0: i32) -> (i32, i32, i32) {
    %c0_i32 = arith.constant 0 : i32
    %c0_i32_0 = arith.constant 0 : i32
    %c0_i32_1 = arith.constant 0 : i32
    return %arg0, %c0_i32, %c0_i32_0 : i32, i32, i32
  }
  func.func @transform_2(%arg0: i32) -> (i32, i32, i32) {
    %c0_i32 = arith.constant 0 : i32
    %c0_i32_0 = arith.constant 0 : i32
    %c0_i32_1 = arith.constant 0 : i32
    return %arg0, %c0_i32, %c0_i32_0 : i32, i32, i32
  }
  func.func @transform_3(%arg0: i32) -> (i32, i32) {
    %c0_i32 = arith.constant 0 : i32
    %c0_i32_0 = arith.constant 0 : i32
    %c0_i32_1 = arith.constant 0 : i32
    return %c0_i32, %c0_i32_0 : i32, i32
  }
  func.func @transform_4(%arg0: i32) -> (i32, i32) {
    %c0_i32 = arith.constant 0 : i32
    %c0_i32_0 = arith.constant 0 : i32
    %c0_i32_1 = arith.constant 0 : i32
    return %c0_i32, %c0_i32_0 : i32, i32
  }
  func.func @transform_5(%arg0: i32) -> (i32, i32) {
    %c0_i32 = arith.constant 0 : i32
    %c0_i32_0 = arith.constant 0 : i32
    %c0_i32_1 = arith.constant 0 : i32
    return %c0_i32, %c0_i32_0 : i32, i32
  }
  func.func @transform_6(%arg0: i32) -> (i32, i32) {
    %c0_i32 = arith.constant 0 : i32
    %c0_i32_0 = arith.constant 0 : i32
    %c0_i32_1 = arith.constant 0 : i32
    return %c0_i32, %c0_i32_0 : i32, i32
  }
  func.func @transform_7(%arg0: i32) -> i32 {
    %c0_i32 = arith.constant 0 : i32
    %c0_i32_0 = arith.constant 0 : i32
    return %c0_i32 : i32
  }
  func.func @transform_8(%arg0: i32) -> (i32, i32, i32) {
    %c0_i32 = arith.constant 0 : i32
    %c0_i32_0 = arith.constant 0 : i32
    %c0_i32_1 = arith.constant 0 : i32
    return %arg0, %c0_i32, %c0_i32_0 : i32, i32, i32
  }
  func.func @transform_9(%arg0: i32) -> (i32, i32) {
    %c0_i32 = arith.constant 0 : i32
    %c0_i32_0 = arith.constant 0 : i32
    return %arg0, %c0_i32 : i32, i32
  }
}

</mosaic_0001>

<bundles_post_ra>
// kernel: effi_encoder_forward.3
= control target key start
LH: loop header
LB: loop body
LE: loop exit
PB: predicated region body
PF: predicated region fallthrough
CT: control target
= control target key end

     0   :  { %vm92_vm0 = vcmask 130048   ;;  %vm261_vm1 = vcmask 523264   ;;  %vm399_vm2 = vcmask 261120   ;;  %s682_s1 = inlined_call_operand.vmem [shape: bf16[16,64], index: 1, kind: input, shape index: {}]   ;;  %s683_s0 = inlined_call_operand.vmem [shape: bf16[128,16], index: 0, kind: input, shape index: {}]   ;;  %s684_s3 = inlined_call_operand.vmem [shape: bf16[64,32], index: 3, kind: input, shape index: {}]   ;;  %s685_s2 = inlined_call_operand.vmem [shape: f32[1,64], index: 2, kind: input, shape index: {}]   ;;  %s686_s4 = inlined_call_operand.vmem [shape: f32[1,32], index: 4, kind: input, shape index: {}]   ;;  %s687_s5 = inlined_call_operand.vmem [shape: f32[128,32], index: 5, kind: output, shape index: {}]  }
   0x1   :  { %v514_v0 = vld [vmem:[%s682_s1] sm:$0xff]   ;;  %v516_v2 = vld [vmem:[%s683_s0 + $0x8] sm:$0xff]   ;;  %v517_v3 = vld [vmem:[%s683_s0 + $0x10] sm:$0xff]  }
   0x2   :  { %v515_v1 = vld [vmem:[%s683_s0] sm:$0xff]   ;;  %472 = vmatprep.subr.bf16.mxu0 %v514_v0  ;;  %v518_v4 = vld [vmem:[%s683_s0 + $0x18] sm:$0xff]   ;;  %v524_v7 = vld [vmem:[%s684_s3 + $0x8] sm:$0xff]  }
   0x3   :  { %473 = vmatpush3.bf16.msra.mxu0 %v514_v0  ;;  %474 = vmatprep.mubr.msk.bf16.mxu0 %vm92_vm0, %v515_v1  ;;  %v519_v5 = vld [vmem:[%s683_s0 + $0x20] sm:$0xff]   ;;  %v520_v8 = vld [vmem:[%s683_s0 + $0x28] sm:$0xff]   ;;  %v521_v9 = vld [vmem:[%s683_s0 + $0x30] sm:$0xff]  }
   0x4   :  { %v523_v6 = vld [vmem:[%s684_s3] sm:$0xff]   ;;  %v522_v10 = vld [vmem:[%s683_s0 + $0x38] sm:$0xff]   ;;  %v525_v11 = vld [vmem:[%s684_s3 + $0x10] sm:$0xff]  }
   0x5   :  { %490 = vmatprep.subr.bf16.mxu1 %v523_v6  ;;  %v526_v12 = vld [vmem:[%s684_s3 + $0x18] sm:$0xff]   ;;  %v420_v14 = vld [vmem:[%s685_s2] ss:$0 sm:$0xff] }
   0x6   :  { %475 = vmatmul.mubr.msk.bf16.vlgmr.msra.gmra.mrb[0].mxu0 %vm92_vm0, %v516_v2  ;;  %491 = vmatpush3.bf16.msra.mxu1 %v523_v6  ;;  %v438_v54 = vld [vmem:[%s686_s4] ss:$0 sm:$0xff] }
   0x7   :  { %478 = vmatprep.mubr.msk.bf16.mxu0 %vm92_vm0, %v517_v3  ;;  %492 = vmatprep.subr.bf16.mxu1 %v524_v7 }
   0xa   :  { %493 = vmatpush3.bf16.msra.mxu1 %v524_v7 }
   0xb   :  { %494 = vmatprep.subr.bf16.mxu1 %v525_v11 }
   0xe   :  { %479 = vmatmul.mubr.msk.bf16.gmra.mrb[4].mxu0 %vm92_vm0, %v518_v4  ;;  %495 = vmatpush3.bf16.msra.mxu1 %v525_v11 }
   0xf   :  { %482 = vmatprep.mubr.msk.bf16.mxu0 %vm92_vm0, %v519_v5  ;;  %496 = vmatprep.subr.bf16.mxu1 %v526_v12 }
  0x12   :  { %497 = vmatpush3.bf16.msra.mxu1 %v526_v12 }
  0x16   :  { %483 = vmatmul.mubr.msk.bf16.gmra.mrb[8].mxu0 %vm92_vm0, %v520_v8 }
  0x17   :  { %486 = vmatprep.mubr.msk.bf16.mxu0 %vm92_vm0, %v521_v9 }
  0x1e   :  { %487 = vmatmul.mubr.msk.bf16.gmra.mrb[12].mxu0 %vm92_vm0, %v522_v10 }
  0xd9   :  { %v476_v13 = vpop.f32.mrb[0].mxu0 }
  0xda   :  { %v151_v15 = vpop.f32.mrb[1].mxu0  ;;  %v160_v17 = vadd.f32 %v476_v13, %v420_v14 }
  0xdb   :  { %v477_v16 = vpop.f32.mrb[2].mxu0  ;;  %v152_v20 = vadd.f32 %v420_v14, %v151_v15 }
  0xdc   :  { %v163_v18 = vadd.f32 %v477_v16, %v420_v14  ;;  %v154_v19 = vpop.f32.mrb[3].mxu0 }
  0xdd   :  { %v155_v21 = vadd.f32 %v420_v14, %v154_v19 }
  0xde   :  { %v223_v22 = vpack.c.bf16 %v163_v18, %v160_v17 }
  0xdf   :  { %v222_v23 = vpack.c.bf16 %v155_v21, %v152_v20 }
  0xe1   :  { %v480_v24 = vpop.f32.mrb[4].mxu0  ;;  %498 = vmatprep.mubr.msk.bf16.mxu1 %vm261_vm1, %v222_v23 }
  0xe2   :  { %v167_v25 = vpop.f32.mrb[5].mxu0  ;;  %499 = vmatmul.mubr.msk.bf16.vlgmr.msra.gmra.mrb[0].mxu1 %vm261_vm1, %v223_v22  ;;  %v176_v27 = vadd.f32 %v480_v24, %v420_v14 }
  0xe3   :  { %v481_v26 = vpop.f32.mrb[6].mxu0  ;;  %v168_v30 = vadd.f32 %v420_v14, %v167_v25 }
  0xe4   :  { %v179_v28 = vadd.f32 %v481_v26, %v420_v14  ;;  %v170_v29 = vpop.f32.mrb[7].mxu0 }
  0xe5   :  { %v171_v31 = vadd.f32 %v420_v14, %v170_v29 }
  0xe6   :  { %v225_v32 = vpack.c.bf16 %v179_v28, %v176_v27 }
  0xe7   :  { %v224_v33 = vpack.c.bf16 %v171_v31, %v168_v30 }
  0xe9   :  { %v484_v34 = vpop.f32.mrb[8].mxu0  ;;  %502 = vmatprep.mubr.msk.bf16.mxu1 %vm261_vm1, %v224_v33 }
  0xea   :  { %v183_v35 = vpop.f32.mrb[9].mxu0  ;;  %503 = vmatmul.mubr.msk.bf16.gmra.mrb[4].mxu1 %vm261_vm1, %v225_v32  ;;  %v192_v37 = vadd.f32 %v484_v34, %v420_v14 }
  0xeb   :  { %v485_v36 = vpop.f32.mrb[10].mxu0  ;;  %v184_v40 = vadd.f32 %v420_v14, %v183_v35 }
  0xec   :  { %v195_v38 = vadd.f32 %v485_v36, %v420_v14  ;;  %v186_v39 = vpop.f32.mrb[11].mxu0 }
  0xed   :  { %v187_v41 = vadd.f32 %v420_v14, %v186_v39 }
  0xee   :  { %v227_v42 = vpack.c.bf16 %v195_v38, %v192_v37 }
  0xef   :  { %v226_v43 = vpack.c.bf16 %v187_v41, %v184_v40 }
  0xf1   :  { %v488_v44 = vpop.f32.mrb[12].mxu0  ;;  %506 = vmatprep.mubr.msk.bf16.mxu1 %vm261_vm1, %v226_v43 }
  0xf2   :  { %v199_v45 = vpop.f32.mrb[13].mxu0  ;;  %507 = vmatmul.mubr.msk.bf16.gmra.mrb[8].mxu1 %vm261_vm1, %v227_v42  ;;  %v208_v47 = vadd.f32 %v488_v44, %v420_v14 }
  0xf3   :  { %v489_v46 = vpop.f32.mrb[14].mxu0  ;;  %v200_v50 = vadd.f32 %v420_v14, %v199_v45 }
  0xf4   :  { %v211_v48 = vadd.f32 %v489_v46, %v420_v14  ;;  %v202_v49 = vpop.f32.mrb[15].mxu0 }
  0xf5   :  { %v203_v51 = vadd.f32 %v420_v14, %v202_v49 }
  0xf6   :  { %v229_v52 = vpack.c.bf16 %v211_v48, %v208_v47 }
  0xf7   :  { %v228_v53 = vpack.c.bf16 %v203_v51, %v200_v50 }
  0xf9   :  { %510 = vmatprep.mubr.msk.bf16.mxu1 %vm261_vm1, %v228_v53 }
  0xfa   :  { %511 = vmatmul.mubr.msk.bf16.gmra.mrb[12].mxu1 %vm261_vm1, %v229_v52 }
 0x1b5   :  { %v500_v55 = vpop.f32.mrb[0].mxu1 }
 0x1b6   :  { %v329_v56 = vadd.f32 %v500_v55, %v438_v54  ;;  %v320_v57 = vpop.f32.mrb[1].mxu1 }
 0x1b7   :  { %v321_v58 = vadd.f32 %v438_v54, %v320_v57  ;;  %v501_v59 = vpop.f32.mrb[2].mxu1 }
 0x1b8   :  { %v385_v60 = vmax.f32 %v329_v56, 0.0  ;;  %v332_v61 = vadd.f32 %v501_v59, %v438_v54  ;;  %v323_v62 = vpop.f32.mrb[3].mxu1 }
 0x1b9   :  { %v383_v63 = vmax.f32 %v321_v58, 0.0  ;;  %v324_v0 = vadd.f32 %v438_v54, %v323_v62 }
 0x1ba   :  { %402 = vst.msk [vmem:[%s687_s5 + $0x10] sm:$0xff] %vm399_vm2, %v385_v60  ;;  %v386_v1 = vmax.f32 %v332_v61, 0.0 }
 0x1bb   :  { %400 = vst.msk [vmem:[%s687_s5] sm:$0xff] %vm399_vm2, %v383_v63  ;;  %v384_v2 = vmax.f32 %v324_v0, 0.0 }
 0x1bc   :  { %403 = vst.msk [vmem:[%s687_s5 + $0x18] sm:$0xff] %vm399_vm2, %v386_v1 }
 0x1bd   :  { %401 = vst.msk [vmem:[%s687_s5 + $0x8] sm:$0xff] %vm399_vm2, %v384_v2  ;;  %v504_v3 = vpop.f32.mrb[4].mxu1 }
 0x1be   :  { %v345_v4 = vadd.f32 %v504_v3, %v438_v54  ;;  %v336_v5 = vpop.f32.mrb[5].mxu1 }
 0x1bf   :  { %v337_v6 = vadd.f32 %v438_v54, %v336_v5  ;;  %v505_v7 = vpop.f32.mrb[6].mxu1 }
 0x1c0   :  { %v389_v8 = vmax.f32 %v345_v4, 0.0  ;;  %v348_v9 = vadd.f32 %v505_v7, %v438_v54  ;;  %v339_v10 = vpop.f32.mrb[7].mxu1 }
 0x1c1   :  { %v387_v11 = vmax.f32 %v337_v6, 0.0  ;;  %v340_v12 = vadd.f32 %v438_v54, %v339_v10 }
 0x1c2   :  { %406 = vst.msk [vmem:[%s687_s5 + $0x30] sm:$0xff] %vm399_vm2, %v389_v8  ;;  %v390_v13 = vmax.f32 %v348_v9, 0.0 }
 0x1c3   :  { %404 = vst.msk [vmem:[%s687_s5 + $0x20] sm:$0xff] %vm399_vm2, %v387_v11  ;;  %v388_v14 = vmax.f32 %v340_v12, 0.0 }
 0x1c4   :  { %407 = vst.msk [vmem:[%s687_s5 + $0x38] sm:$0xff] %vm399_vm2, %v390_v13 }
 0x1c5   :  { %405 = vst.msk [vmem:[%s687_s5 + $0x28] sm:$0xff] %vm399_vm2, %v388_v14  ;;  %v508_v15 = vpop.f32.mrb[8].mxu1 }
 0x1c6   :  { %v361_v16 = vadd.f32 %v508_v15, %v438_v54  ;;  %v352_v17 = vpop.f32.mrb[9].mxu1 }
 0x1c7   :  { %v353_v18 = vadd.f32 %v438_v54, %v352_v17  ;;  %v509_v19 = vpop.f32.mrb[10].mxu1 }
 0x1c8   :  { %v393_v20 = vmax.f32 %v361_v16, 0.0  ;;  %v364_v21 = vadd.f32 %v509_v19, %v438_v54  ;;  %v355_v22 = vpop.f32.mrb[11].mxu1 }
 0x1c9   :  { %v391_v23 = vmax.f32 %v353_v18, 0.0  ;;  %v356_v24 = vadd.f32 %v438_v54, %v355_v22 }
 0x1ca   :  { %410 = vst.msk [vmem:[%s687_s5 + $0x50] sm:$0xff] %vm399_vm2, %v393_v20  ;;  %v394_v25 = vmax.f32 %v364_v21, 0.0 }
 0x1cb   :  { %408 = vst.msk [vmem:[%s687_s5 + $0x40] sm:$0xff] %vm399_vm2, %v391_v23  ;;  %v392_v26 = vmax.f32 %v356_v24, 0.0 }
 0x1cc   :  { %411 = vst.msk [vmem:[%s687_s5 + $0x58] sm:$0xff] %vm399_vm2, %v394_v25 }
 0x1cd   :  { %409 = vst.msk [vmem:[%s687_s5 + $0x48] sm:$0xff] %vm399_vm2, %v392_v26  ;;  %v512_v27 = vpop.f32.mrb[12].mxu1 }
 0x1ce   :  { %v377_v28 = vadd.f32 %v512_v27, %v438_v54  ;;  %v368_v29 = vpop.f32.mrb[13].mxu1 }
 0x1cf   :  { %v369_v30 = vadd.f32 %v438_v54, %v368_v29  ;;  %v513_v31 = vpop.f32.mrb[14].mxu1 }
 0x1d0   :  { %v397_v32 = vmax.f32 %v377_v28, 0.0  ;;  %v380_v33 = vadd.f32 %v513_v31, %v438_v54  ;;  %v371_v34 = vpop.f32.mrb[15].mxu1 }
 0x1d1   :  { %v395_v35 = vmax.f32 %v369_v30, 0.0  ;;  %v372_v36 = vadd.f32 %v438_v54, %v371_v34 }
 0x1d2   :  { %414 = vst.msk [vmem:[%s687_s5 + $0x70] sm:$0xff] %vm399_vm2, %v397_v32  ;;  %v398_v37 = vmax.f32 %v380_v33, 0.0 }
 0x1d3   :  { %412 = vst.msk [vmem:[%s687_s5 + $0x60] sm:$0xff] %vm399_vm2, %v395_v35  ;;  %v396_v38 = vmax.f32 %v372_v36, 0.0 }
 0x1d4   :  { %415 = vst.msk [vmem:[%s687_s5 + $0x78] sm:$0xff] %vm399_vm2, %v398_v37 }
 0x1d5   :  { %413 = vst.msk [vmem:[%s687_s5 + $0x68] sm:$0xff] %vm399_vm2, %v396_v38 }

// kernel: effi_encoder_forward.4
= control target key start
LH: loop header
LB: loop body
LE: loop exit
PB: predicated region body
PF: predicated region fallthrough
CT: control target
= control target key end

     0   :  { %vm60_vm0 = vcmask 261120   ;;  %s435_s1 = inlined_call_operand.vmem [shape: bf16[32,128], index: 1, kind: input, shape index: {}]   ;;  %s436_s0 = inlined_call_operand.vmem [shape: bf16[32,32], index: 0, kind: input, shape index: {}]   ;;  %s437_s3 = inlined_call_operand.vmem [shape: bf16[128,32], index: 3, kind: input, shape index: {}]   ;;  %s438_s2 = inlined_call_operand.vmem [shape: f32[1,128], index: 2, kind: input, shape index: {}]   ;;  %s439_s5 = inlined_call_operand.vmem [shape: f32[32,128], index: 5, kind: output, shape index: {0}]   ;;  %s440_s4 = inlined_call_operand.vmem [shape: f32[1,32], index: 4, kind: input, shape index: {}]   ;;  %s441_s6 = inlined_call_operand.vmem [shape: f32[32,32], index: 6, kind: output, shape index: {1}]  }
   0x1   :  { %v316_v0 = vld [vmem:[%s435_s1] sm:$0xff]   ;;  %v317_v1 = vld [vmem:[%s435_s1 + $0x8] sm:$0xff]   ;;  %v322_v6 = vld [vmem:[%s437_s3 + $0x10] sm:$0xff]  }
   0x2   :  { %288 = vmatprep.subr.bf16.mxu0 %v316_v0  ;;  %v318_v2 = vld [vmem:[%s436_s0] sm:$0xff]   ;;  %v321_v4 = vld [vmem:[%s437_s3 + $0x8] sm:$0xff]   ;;  %v323_v7 = vld [vmem:[%s437_s3 + $0x18] sm:$0xff]  }
   0x3   :  { %289 = vmatpush3.bf16.msra.mxu0 %v316_v0  ;;  %292 = vmatprep.mubr.msk.bf16.mxu0 %vm60_vm0, %v318_v2  ;;  %v320_v3 = vld [vmem:[%s437_s3] sm:$0xff]   ;;  %v319_v5 = vld [vmem:[%s436_s0 + $0x8] sm:$0xff]   ;;  %v326_v10 = vld [vmem:[%s437_s3 + $0x30] sm:$0xff]  }
   0x4   :  { %290 = vmatprep.subr.bf16.mxu0 %v317_v1  ;;  %296 = vmatprep.subr.bf16.mxu1 %v320_v3  ;;  %v324_v8 = vld [vmem:[%s437_s3 + $0x20] sm:$0xff]   ;;  %v325_v9 = vld [vmem:[%s437_s3 + $0x28] sm:$0xff]   ;;  %v327_v11 = vld [vmem:[%s437_s3 + $0x38] sm:$0xff]  }
   0x5   :  { %297 = vmatpush3.bf16.msra.mxu1 %v320_v3  ;;  %v258_v12 = vld [vmem:[%s438_s2] ss:$0 sm:$0xff] }
   0x6   :  { %298 = vmatprep.subr.bf16.mxu1 %v321_v4  ;;  %v265_v23 = vld [vmem:[%s440_s4] ss:$0 sm:$0xff] }
   0x7   :  { %291 = vmatpush3.bf16.msra.mxu0 %v317_v1 }
   0x9   :  { %299 = vmatpush3.bf16.msra.mxu1 %v321_v4 }
   0xa   :  { %293 = vmatmul.mubr.msk.bf16.vlgmr.msra.gmra.mrb[0].mxu0 %vm60_vm0, %v319_v5  ;;  %300 = vmatprep.subr.bf16.mxu1 %v322_v6 }
   0xd   :  { %301 = vmatpush3.bf16.msra.mxu1 %v322_v6 }
   0xe   :  { %302 = vmatprep.subr.bf16.mxu1 %v323_v7 }
  0x11   :  { %303 = vmatpush3.bf16.msra.mxu1 %v323_v7 }
  0x12   :  { %304 = vmatprep.subr.bf16.mxu1 %v324_v8 }
  0x15   :  { %305 = vmatpush3.bf16.msra.mxu1 %v324_v8 }
  0x16   :  { %306 = vmatprep.subr.bf16.mxu1 %v325_v9 }
  0x19   :  { %307 = vmatpush3.bf16.msra.mxu1 %v325_v9 }
  0x1a   :  { %308 = vmatprep.subr.bf16.mxu1 %v326_v10 }
  0x1d   :  { %309 = vmatpush3.bf16.msra.mxu1 %v326_v10 }
  0x1e   :  { %310 = vmatprep.subr.bf16.mxu1 %v327_v11 }
  0x21   :  { %311 = vmatpush3.bf16.msra.mxu1 %v327_v11 }
  0xdd   :  { %v294_v13 = vpop.f32.mrb[0].mxu0 }
  0xde   :  { %v110_v14 = vadd.f32 %v294_v13, %v258_v12  ;;  %v101_v15 = vpop.f32.mrb[1].mxu0 }
  0xdf   :  { %v102_v16 = vadd.f32 %v258_v12, %v101_v15  ;;  %v295_v17 = vpop.f32.mrb[2].mxu0 }
  0xe0   :  { %118 = vst [vmem:[%s439_s5 + $0x10] sm:$0xff] %v110_v14  ;;  %v113_v18 = vadd.f32 %v295_v17, %v258_v12  ;;  %v104_v19 = vpop.f32.mrb[3].mxu0 }
  0xe1   :  { %116 = vst [vmem:[%s439_s5] sm:$0xff] %v102_v16  ;;  %v105_v20 = vadd.f32 %v258_v12, %v104_v19 }
  0xe2   :  { %119 = vst [vmem:[%s439_s5 + $0x18] sm:$0xff] %v113_v18  ;;  %v137_v21 = vpack.c.bf16 %v113_v18, %v110_v14 }
  0xe3   :  { %117 = vst [vmem:[%s439_s5 + $0x8] sm:$0xff] %v105_v20  ;;  %v136_v22 = vpack.c.bf16 %v105_v20, %v102_v16 }
  0xe5   :  { %312 = vmatprep.mubr.bf16.mxu1 %v136_v22 }
  0xe6   :  { %313 = vmatmul.mubr.bf16.vlgmr.msra.gmra.mrb[0].mxu1 %v137_v21 }
 0x1b9   :  { %v314_v24 = vpop.f32.mrb[0].mxu1 }
 0x1ba   :  { %v236_v25 = vadd.f32 %v314_v24, %v265_v23  ;;  %v227_v26 = vpop.f32.mrb[1].mxu1 }
 0x1bb   :  { %v228_v27 = vadd.f32 %v265_v23, %v227_v26  ;;  %v315_v28 = vpop.f32.mrb[2].mxu1 }
 0x1bc   :  { %v244_v29 = vmax.f32 %v236_v25, 0.0  ;;  %v239_v30 = vadd.f32 %v315_v28, %v265_v23  ;;  %v230_v31 = vpop.f32.mrb[3].mxu1 }
 0x1bd   :  { %v242_v32 = vmax.f32 %v228_v27, 0.0  ;;  %v231_v33 = vadd.f32 %v265_v23, %v230_v31 }
 0x1be   :  { %248 = vst.msk [vmem:[%s441_s6 + $0x10] sm:$0xff] %vm60_vm0, %v244_v29  ;;  %v245_v34 = vmax.f32 %v239_v30, 0.0 }
 0x1bf   :  { %246 = vst.msk [vmem:[%s441_s6] sm:$0xff] %vm60_vm0, %v242_v32  ;;  %v243_v35 = vmax.f32 %v231_v33, 0.0 }
 0x1c0   :  { %249 = vst.msk [vmem:[%s441_s6 + $0x18] sm:$0xff] %vm60_vm0, %v245_v34 }
 0x1c1   :  { %247 = vst.msk [vmem:[%s441_s6 + $0x8] sm:$0xff] %vm60_vm0, %v243_v35 }

// kernel: effi_encoder_forward.5
= control target key start
LH: loop header
LB: loop body
LE: loop exit
PB: predicated region body
PF: predicated region fallthrough
CT: control target
= control target key end

     0   :  { %16 = vsyncpa [#allocation4], 0  ;;  %vm60_vm0 = vcmask 523264   ;;  %s1209_s0 = inlined_call_operand.vmem [shape: f32[2,16,32], index: 0, kind: input, shape index: {}]   ;;  %s1210_s1 = inlined_call_operand.vmem [shape: f32[2,64,32], index: 1, kind: input, shape index: {}]   ;;  %s1211_s2 = inlined_call_operand.vmem [shape: f32[2,16,128], index: 2, kind: input, shape index: {}]   ;;  %s1212_s3 = inlined_call_operand.vmem [shape: f32[16,64], index: 3, kind: input, shape index: {}]   ;;  %s1213_s4 = inlined_call_operand.vmem [shape: f32[32,1], index: 4, kind: input, shape index: {}]   ;;  %s1214_s5 = inlined_call_operand.vmem [shape: f32[128,5], index: 5, kind: input, shape index: {}]   ;;  %s1215_s6 = inlined_call_operand.vmem [shape: f32[1,5], index: 6, kind: input, shape index: {}]   ;;  %s1216_s7 = inlined_call_operand.<no memory space> [shape: f32[1], index: 7, kind: input, shape index: {}]   ;;  %s1217_s8 = inlined_call_operand.hbm [shape: f32[2,16,32], index: 8, kind: output, shape index: {0}]   ;;  %s1218_s9 = inlined_call_operand.hbm [shape: f32[2,5], index: 9, kind: output, shape index: {1}]  }
   0x1   :  { %v38_v0 = vld [vmem:[%s1210_s1] sm:$0xff]  ;;  %v39_v1 = vld [vmem:[%s1210_s1 + $0x8] sm:$0xff]  ;;  %v40_v2 = vld [vmem:[%s1210_s1 + $0x10] sm:$0xff] }
   0x2   :  { %v844_v3 = vpack.c.bf16 %v39_v1, %v38_v0  ;;  %v41_v4 = vld [vmem:[%s1210_s1 + $0x18] sm:$0xff]  ;;  %v42_v6 = vld [vmem:[%s1210_s1 + $0x20] sm:$0xff]  ;;  %v43_v7 = vld [vmem:[%s1210_s1 + $0x28] sm:$0xff] }
   0x3   :  { %v848_v5 = vpack.c.bf16 %v41_v4, %v40_v2  ;;  %v58_v8 = vld [vmem:[%s1212_s3] sm:$0xff]  ;;  %v852_v9 = vpack.c.bf16 %v43_v7, %v42_v6  ;;  %v44_v10 = vld [vmem:[%s1210_s1 + $0x30] sm:$0xff]  ;;  %v45_v11 = vld [vmem:[%s1210_s1 + $0x38] sm:$0xff] }
   0x4   :  { %845 = vmatprep.subr.bf16.mxu1 %v844_v3  ;;  %759 = vmatprep.mubr.msk.f32.mxu1 %vm60_vm0, %v58_v8  ;;  %v226_v12 = vld [vmem:[%s1213_s4] sm:$0xff]  ;;  %v227_v13 = vld [vmem:[%s1213_s4 + $0x8] sm:$0xff] }
   0x5   :  { %847 = vmatpush3.bf16.msra.mxu1 %v844_v3  ;;  %v876_v14 = vpack.c.bf16 %v227_v13, %v226_v12 }
   0x6   :  { %849 = vmatprep.subr.bf16.mxu1 %v848_v5 }
   0x7   :  { %17 = vsyncpa [#allocation6], 0  ;;  %v856_v15 = vpack.c.bf16 %v45_v11, %v44_v10  ;;  %877 = vmatprep.subr.bf16.mxu0 %v876_v14  ;;  %v46_v16 = vld [vmem:[%s1210_s1 + $0x40] sm:$0xff]  ;;  %v47_v17 = vld [vmem:[%s1210_s1 + $0x48] sm:$0xff]  ;;  %vm221_vm1 = vcmask 261120   ;;  %v969_v46 = vmov 0.0|0.0  }
   0x8   :  { %879 = vmatpush3.bf16.msra.mxu0 %v876_v14  ;;  %v860_v18 = vpack.c.bf16 %v47_v17, %v46_v16  ;;  %v48_v19 = vld [vmem:[%s1210_s1 + $0x50] sm:$0xff]  ;;  %v49_v20 = vld [vmem:[%s1210_s1 + $0x58] sm:$0xff]  ;;  %v59_v21 = vld [vmem:[%s1212_s3 + $0x8] sm:$0xff]  ;;  %vm970_vm2 = vmmov 0   ;;  %v971_v48 = vmov 0.0   ;;  %vm359_vm3 = vcmask 130048  }
   0x9   :  { %851 = vmatpush3.bf16.msra.mxu1 %v848_v5  ;;  %v864_v22 = vpack.c.bf16 %v49_v20, %v48_v19  ;;  %v50_v23 = vld [vmem:[%s1210_s1 + $0x60] sm:$0xff]  ;;  %v51_v24 = vld [vmem:[%s1210_s1 + $0x68] sm:$0xff]  ;;  %v52_v26 = vld [vmem:[%s1210_s1 + $0x70] sm:$0xff]  ;;  %vm576_vm6 = vcmask 1041409  }
   0xa   :  { %853 = vmatprep.subr.bf16.mxu1 %v852_v9  ;;  %v868_v25 = vpack.c.bf16 %v51_v24, %v50_v23  ;;  %v53_v27 = vld [vmem:[%s1210_s1 + $0x78] sm:$0xff]  ;;  %v228_v29 = vld [vmem:[%s1213_s4 + $0x10] sm:$0xff]  ;;  %v35_v32 = vld [vmem:[%s1209_s0 + $0x8] sm:$0xff] }
   0xb   :  { %v872_v28 = vpack.c.bf16 %v53_v27, %v52_v26  ;;  %v229_v30 = vld [vmem:[%s1213_s4 + $0x18] sm:$0xff]  ;;  %v34_v33 = vld [vmem:[%s1209_s0] sm:$0xff]  ;;  %v36_v39 = vld [vmem:[%s1209_s0 + $0x10] sm:$0xff] }
   0xc   :  { %v880_v31 = vpack.c.bf16 %v229_v30, %v228_v29  ;;  %v37_v38 = vld [vmem:[%s1209_s0 + $0x18] sm:$0xff]  ;;  %v54_v44 = vld [vmem:[%s1211_s2] sm:$0xff]  ;;  %v55_v45 = vld [vmem:[%s1211_s2 + $0x8] sm:$0xff] }
   0xd   :  { %855 = vmatpush3.bf16.msra.mxu1 %v852_v9  ;;  %v885_v47 = vpack.c.bf16 %v55_v45, %v54_v44  ;;  %v550_v53 = vld [vmem:[%s1214_s5] sm:$0xff]  ;;  %v551_v54 = vld [vmem:[%s1214_s5 + $0x8] sm:$0xff]  ;;  %v552_v55 = vld [vmem:[%s1214_s5 + $0x10] sm:$0xff] }
   0xe   :  { %857 = vmatprep.subr.bf16.mxu1 %v856_v15  ;;  %881 = vmatprep.subr.bf16.mxu0 %v880_v31  ;;  %v891_v56 = vpack.c.bf16 %v551_v54, %v550_v53  ;;  %v553_v57 = vld [vmem:[%s1214_s5 + $0x18] sm:$0xff]  ;;  %v554_v59 = vld [vmem:[%s1214_s5 + $0x20] sm:$0xff]  ;;  %v555_v60 = vld [vmem:[%s1214_s5 + $0x28] sm:$0xff] }
   0xf   :  { %883 = vmatpush3.bf16.msra.mxu0 %v880_v31  ;;  %v894_v58 = vpack.c.bf16 %v553_v57, %v552_v55  ;;  %v897_v61 = vpack.c.bf16 %v555_v60, %v554_v59  ;;  %v556_v62 = vld [vmem:[%s1214_s5 + $0x30] sm:$0xff]  ;;  %v557_v63 = vld [vmem:[%s1214_s5 + $0x38] sm:$0xff]  ;;  %v558_v6 = vld [vmem:[%s1214_s5 + $0x40] sm:$0xff] }
  0x10   :  { %890 = vmatprep.subr.bf16.mxu0 %v969_v46  ;;  %v900_v0 = vpack.c.bf16 %v557_v63, %v556_v62  ;;  %v56_v1 = vld [vmem:[%s1211_s2 + $0x10] sm:$0xff]  ;;  %v57_v2 = vld [vmem:[%s1211_s2 + $0x18] sm:$0xff]  ;;  %v559_v7 = vld [vmem:[%s1214_s5 + $0x48] sm:$0xff] }
  0x11   :  { %859 = vmatpush3.bf16.msra.mxu1 %v856_v15  ;;  %v888_v3 = vpack.c.bf16 %v57_v2, %v56_v1  ;;  %v560_v9 = vld [vmem:[%s1214_s5 + $0x50] sm:$0xff]  ;;  %v561_v10 = vld [vmem:[%s1214_s5 + $0x58] sm:$0xff]  ;;  %v562_v12 = vld [vmem:[%s1214_s5 + $0x60] sm:$0xff] }
  0x12   :  { %861 = vmatprep.subr.bf16.mxu1 %v860_v18  ;;  %v906_v11 = vpack.c.bf16 %v561_v10, %v560_v9  ;;  %v563_v13 = vld [vmem:[%s1214_s5 + $0x68] sm:$0xff]  ;;  %v564_v15 = vld [vmem:[%s1214_s5 + $0x70] sm:$0xff]  ;;  %v565_v16 = vld [vmem:[%s1214_s5 + $0x78] sm:$0xff]  ;;  %s972_s5 = smov [#allocation3]  }
  0x13   :  { %v909_v14 = vpack.c.bf16 %v563_v13, %v562_v12  ;;  %v912_v17 = vpack.c.bf16 %v565_v16, %v564_v15  ;;  %s656_s30 = sshll.u32 %s972_s5, 4  ;;  %s657_s30 = int_to_ptr.vmem [resolvable:$true] %s656_s30 }
  0x14   :  { %760 = vmatmul.mubr.msk.f32.vlgmr.msra.gmra.mrb[0].mxu1 %vm60_vm0, %v59_v21  ;;  %s921_s1 = scalar_lea.vmem %s657_s30, 512  ;;  %p926_p1 = scmp.lt.s32.totalorder %s657_s30, %s657_s30 }
  0x15   :  { %863 = vmatpush3.bf16.msra.mxu1 %v860_v18  ;;  %778 = vmatprep.mubr.msk.f32.mxu1 %vm60_vm0, %v58_v8  ;;  %v903_v8 = vpack.c.bf16 %v559_v7, %v558_v6  ;;  %p922_p0 = scmp.ne.s32.totalorder %s657_s30, %s921_s1  ;;  %p927_p2 = scmp.lt.s32.totalorder %s921_s1, %s921_s1 }
  0x16   :  { %865 = vmatprep.subr.bf16.mxu1 %v864_v22 }
  0x17   :  { %p928_p3 = por %p927_p2, %p926_p1 }
  0x19   :  { %867 = vmatpush3.bf16.msra.mxu1 %v864_v22  ;;  %p929_p4 = pnand %p928_p3, %p922_p0 }
  0x1a   :  { %869 = vmatprep.subr.bf16.mxu1 %v868_v25 }
  0x1d   :  { %871 = vmatpush3.bf16.msra.mxu1 %v868_v25 }
  0x1e   :  { %873 = vmatprep.subr.bf16.mxu1 %v872_v28 }
  0x21   :  { %875 = vmatpush3.bf16.msra.mxu1 %v872_v28 }
  0x22   :  { %884 = vmatprep.subr.bf16.mxu1 %v969_v46 }
  0x24   :  { %779 = vmatmul.mubr.msk.f32.vlgmr.msra.gmra.mrb[2].mxu1 %vm60_vm0, %v59_v21  ;;  %v541_v21 = vstv %s1216_s7 }
  0x25   :  { %799 = vmatprep.mubr.msk.f32.mxu1 %vm970_vm2, %v971_v48  ;;  %886 = vmatpush3.bf16.msra.mxu1 %v885_v47 }
  0x26   :  { %887 = vmatprep.subr.bf16.mxu1 %v969_v46 }
  0xe7   :  { %v761_v34 = vpop.f32.mrb[0].mxu1 }
  0xe8   :  { %v218_v35 = vadd.f32 %v761_v34, %v35_v32  ;;  %v133_v36 = vpop.f32.mrb[1].mxu1 }
  0xe9   :  { %v217_v37 = vadd.f32 %v133_v36, %v34_v33 }
  0xea   :  { %223 = vst.msk [vmem:[#allocation3 + $0x8] sm:$0xff] %vm221_vm1, %v218_v35 }
  0xeb   :  { %222 = vst.msk [vmem:[#allocation3] sm:$0xff] %vm221_vm1, %v217_v37  ;;  %789 = vmatprep.mubr.msk.f32.mxu0 %vm221_vm1, %v217_v37 }
  0xec   :  { %790 = vmatmul.mubr.msk.f32.vlgmr.msra.gmra.mrb[0].mxu0 %vm221_vm1, %v218_v35 }
  0xed   :  { %892 = vmatpush3.bf16.msra.mxu0 %v891_v56 }
  0xee   :  { %893 = vmatprep.subr.bf16.mxu0 %v969_v46 }
  0xf1   :  { %895 = vmatpush3.bf16.msra.mxu0 %v894_v58 }
  0xf2   :  { %896 = vmatprep.subr.bf16.mxu0 %v969_v46 }
  0xf5   :  { %898 = vmatpush3.bf16.msra.mxu0 %v897_v61 }
  0xf6   :  { %899 = vmatprep.subr.bf16.mxu0 %v969_v46 }
  0xf7   :  { %v780_v40 = vpop.f32.mrb[2].mxu1 }
  0xf8   :  { %v220_v41 = vadd.f32 %v780_v40, %v37_v38  ;;  %v208_v42 = vpop.f32.mrb[3].mxu1 }
  0xf9   :  { %v219_v43 = vadd.f32 %v208_v42, %v36_v39  ;;  %901 = vmatpush3.bf16.msra.mxu0 %v900_v0 }
  0xfa   :  { %225 = vst.msk [vmem:[#allocation3 + $0x18] sm:$0xff] %vm221_vm1, %v220_v41  ;;  %902 = vmatprep.subr.bf16.mxu0 %v969_v46 }
  0xfb   :  { %224 = vst.msk [vmem:[#allocation3 + $0x10] sm:$0xff] %vm221_vm1, %v219_v43  ;;  %792 = vmatprep.mubr.msk.f32.mxu0 %vm221_vm1, %v219_v43 }
  0xfc   :  { %793 = vmatmul.mubr.msk.f32.gmra.mrb[2].mxu0 %vm221_vm1, %v220_v41 }
  0xfd   :  { %841 = vmatprep.mubr.msk.f32.mxu0 %vm970_vm2, %v971_v48  ;;  %904 = vmatpush3.bf16.msra.mxu0 %v903_v8 }
  0xfe   :  { %905 = vmatprep.subr.bf16.mxu0 %v969_v46 }
 0x101   :  { %907 = vmatpush3.bf16.msra.mxu0 %v906_v11 }
 0x102   :  { %908 = vmatprep.subr.bf16.mxu0 %v969_v46 }
 0x105   :  { %910 = vmatpush3.bf16.msra.mxu0 %v909_v14 }
 0x106   :  { %911 = vmatprep.subr.bf16.mxu0 %v969_v46 }
 0x109   :  { %913 = vmatpush3.bf16.msra.mxu0 %v912_v17 }
 0x1bf   :  { %v791_v49 = vpop.f32.mrb[0].mxu0 }
 0x1c0   :  { %v308_v50 = vpop.f32.mrb[1].mxu0 }
 0x1c1   :  { %327 = vxpose.xlu0.b32.start [1/2] (short) (narrow) %v308_v50, 8 }
 0x1c5   :  { %328 = vxpose.xlu0.b32.end [2/2] (short) (narrow) %v791_v49, 8 }
 0x1cf   :  { %v794_v51 = vpop.f32.mrb[2].mxu0 }
 0x1d0   :  { %v318_v52 = vpop.f32.mrb[3].mxu0 }
 0x1d1   :  { %433 = vxpose.xlu1.b32.start [1/2] (short) (narrow) %v318_v52, 8 }
 0x1d5   :  { %434 = vxpose.xlu1.b32.end [2/2] (short) (narrow) %v794_v51, 8 }
 0x241   :  { %v343_v4 = vpop.trf.xlu0 }
 0x242   :  { %800 = vmatmul.mubr.msk.f32.vlgmr.msra.gmra.mrb[4].mxu1 %vm359_vm3, %v343_v4 }
 0x243   :  { %889 = vmatpush3.bf16.msra.mxu1 %v888_v3  ;;  %806 = vmatprep.mubr.msk.f32.mxu1 %vm970_vm2, %v971_v48 }
 0x251   :  { %v449_v5 = vpop.trf.xlu1 }
 0x252   :  { %807 = vmatmul.mubr.msk.f32.vlgmr.msra.gmra.mrb[6].mxu1 %vm359_vm3, %v449_v5 }
 0x315   :  { %v429_v18 = vpop.f32.mrb[4].mxu1 }
 0x316   :  { %v801_v19 = vpop.f32.mrb[5].mxu1  ;;  %v538_v20 = vmul.f32 0.0625, %v429_v18 }
 0x318   :  { %v542_v23 = vadd.f32 %v541_v21, %v538_v20 }
 0x31a   :  { %v546_v27 = vmul.f32 0.01, %v542_v23  ;;  %vm544_vm5 = vcmp.ge.f32.partialorder %v542_v23, 0.0 }
 0x31c   :  { %v548_v31 = vsel %vm544_vm5, %v542_v23, %v546_v27 }
 0x325   :  { %v534_v22 = vpop.f32.mrb[6].mxu1 }
 0x326   :  { %v539_v24 = vmul.f32 0.0625, %v534_v22  ;;  %v808_v25 = vpop.f32.mrb[7].mxu1 }
 0x328   :  { %v543_v26 = vadd.f32 %v541_v21, %v539_v24 }
 0x32a   :  { %vm545_vm4 = vcmp.ge.f32.partialorder %v543_v26, 0.0  ;;  %v547_v28 = vmul.f32 0.01, %v543_v26 }
 0x32c   :  { %v549_v29 = vsel %vm545_vm4, %v543_v26, %v547_v28 }
 0x32d   :  { %v575_v30 = vrot.slane %v549_v29, 7 }
 0x32f   :  { %v577_v32 = vsel %vm576_vm6, %v575_v30, %v548_v31 }
 0x330   :  { %842 = vmatmul.mubr.f32.vlgmr.msra.gmra.mrb[4].mxu0 %v577_v32 }
 0x331   :  { %932 = shalt.err (!%p929_p4)
}
 0x332   :  { %s933_s11 = scalar_lea.hbm %s1217_s8, 512 }
 0x333   :  { %p934_p5 = scmp.ne.s32.totalorder %s1217_s8, %s933_s11  ;;  %p937_p6 = scmp.lt.u32.totalorder %s933_s11, %s1217_s8 }
 0x335   :  { %p939_p7 = pnand %p937_p6, %p934_p5 }
 0x337   :  { %942 = shalt.err (!%p939_p7)
}
 0x338   :  { %s973_s15 = smov 128   ;;  %s974_s16 = smov 8   ;;  %v691_v33 = vld [vmem:[%s1215_s6] ss:$0 sm:$0xff]  ;;  %vm649_vm7 = vcmask 33792  }
 0x339   :  { %662 = dma.vmem_to_hbm [thread:$0]  %s657_s30, 512, %s1217_s8, [#allocation4], %s973_s15, %s973_s15, %s974_s16  }
 0x33a   :  { %s975_s0 = smov [#allocation5]  }
 0x33b   :  { %s669_s20 = sshll.u32 %s975_s0, 4  ;;  %s670_s20 = int_to_ptr.vmem [resolvable:$true] %s669_s20 }
 0x33c   :  { %s943_s21 = scalar_lea.vmem %s670_s20, 32  ;;  %p948_p9 = scmp.lt.s32.totalorder %s670_s20, %s670_s20 }
 0x33d   :  { %p944_p8 = scmp.ne.s32.totalorder %s670_s20, %s943_s21  ;;  %p949_p10 = scmp.lt.s32.totalorder %s943_s21, %s943_s21 }
 0x33f   :  { %p950_p11 = por %p949_p10, %p948_p9 }
 0x341   :  { %p951_p12 = pnand %p950_p11, %p944_p8 }
 0x403   :  { %v645_v34 = vpop.f32.mrb[4].mxu0 }
 0x404   :  { %v646_v35 = vadd.f32 %v691_v33, %v645_v34  ;;  %v843_v36 = vpop.f32.mrb[5].mxu0 }
 0x406   :  { %650 = vst.msk [vmem:[#allocation5] sm:$0x3] %vm649_vm7, %v646_v35 }
 0x407   :  { %954 = shalt.err (!%p951_p12)
}
 0x408   :  { %s955_s23 = scalar_lea.hbm %s1218_s9, 32 }
 0x409   :  { %p956_p13 = scmp.ne.s32.totalorder %s1218_s9, %s955_s23  ;;  %p959_p0 = scmp.lt.u32.totalorder %s955_s23, %s1218_s9 }
 0x40b   :  { %p961_p1 = pnand %p959_p0, %p956_p13 }
 0x40d   :  { %964 = shalt.err (!%p961_p1)
}
 0x40e   :  { %672 = dma.vmem_to_hbm [thread:$0]  %s670_s20, 32, %s1218_s9, [#allocation6]  }
 0x40f   :  { %965 = dma.done.wait [#allocation4], 512  }
 0x410   :  { %966 = vsyncadd [#allocation4], 4294966784 }
 0x411   :  { %967 = dma.done.wait [#allocation6], 32  }
 0x412   :  { %968 = vsyncadd [#allocation6], 4294967264 }
 0x413   :  { %679 = vsyncpa [#allocation4], 1 }
 0x414   :  { %680 = vsyncpa [#allocation6], 1 }

</bundles_post_ra>
